<compile_context>
chip_gen: v7x
topology: tpu7x:2x2x1
jax: 0.10.0
libtpu: 0.0.40
codegen_flags: <defaults>
</compile_context>

<pallas_src>
import jax
import jax.numpy as jnp
from jax.experimental import pallas as pl
from jax.experimental.pallas import tpu as pltpu


def ib_kernel(x_ref, eps_ref, params_ref, mu_ref, t_ref):
    """Elementwise IB gate for one (tb, Dp) batch tile.

    x_ref      : (tb, Dp) input activations
    eps_ref    : (tb, Dp) standard-normal noise
    params_ref : (2, Dp)  row 0 = sigmoid(alpha), row 1 = 1 - sigmoid(alpha)
    """
    lamb = params_ref[0:1, :]      # (1, Dp), broadcasts over the batch tile
    sigma = params_ref[1:2, :]     # (1, Dp)  == sqrt((1 - lamb)^2)

    x = x_ref[...]
    mu = x * lamb
    mu_ref[...] = mu
    t_ref[...] = mu + sigma * eps_ref[...]


def _round_up(v, m):
    return ((v + m - 1) // m) * m


def _choose_tb(bp, dp, vmem_budget_bytes=12 << 20, cap_rows=1024):
    """Batch tile: multiple of 8, divides bp, double-buffered tiles fit budget.

    Per grid step there are 4 (tb, dp) f32 tiles (x, eps, mu, t), each
    double-buffered by the Pallas pipeline.  The budget is kept well under
    v5e's 16 MiB default scoped-VMEM limit; capping rows keeps many grid steps
    for pipeline overlap and v7x two-TensorCore load balance.
    """
    per_row = 4 * 2 * dp * 4
    cap = max(8, min(cap_rows, (vmem_budget_bytes // per_row) // 8 * 8))
    tb = min(cap, bp)
    # Largest multiple of 8 <= cap that divides bp (bp is a multiple of 8,
    # so this terminates at 8 in the worst case).
    while bp % tb != 0:
        tb -= 8
    return tb


def ib_forward(x, alpha, key):
    """IB forward pass: returns (masked_mu, log(masked_var), t).

    x:     (B, D) float32 activations
    alpha: (D,)   float32 parameter
    key:   jax PRNG key for the reparameterization noise (thread a fresh key
           per call, matching torch's per-forward .normal_()).
    """
    B, D = x.shape

    # alpha-only math, hoisted out of the per-tile body, computed in f32.
    lamb = jax.nn.sigmoid(alpha.astype(jnp.float32))
    sigma = 1.0 - lamb
    logvar_row = 2.0 * jnp.log(sigma)            # == log((1 - lamb)^2)

    # log(masked_var) is a pure function of alpha: return it as a lazy
    # broadcast instead of writing a full (B, D) array from the kernel.
    logvar = jnp.broadcast_to(logvar_row.astype(x.dtype)[None, :], (B, D))

    # Reparameterization noise (generated outside the kernel; in-kernel
    # hardware PRNG primitives are not available on all execution paths).
    eps = jax.random.normal(key, (B, D), dtype=x.dtype)

    # Minimal padding: B -> multiple of 8 (sublane), D -> multiple of 128
    # (lane-dense, unmasked vector stores).  Skipped entirely when not needed.
    Bp = _round_up(max(B, 8), 8)
    Dp = _round_up(D, 128)
    pad_b, pad_d = Bp - B, Dp - D
    if pad_b or pad_d:
        x_p = jnp.pad(x, ((0, pad_b), (0, pad_d)))
        eps_p = jnp.pad(eps, ((0, pad_b), (0, pad_d)))
    else:
        x_p, eps_p = x, eps

    params = jnp.stack(
        [jnp.pad(lamb, (0, pad_d)), jnp.pad(sigma, (0, pad_d))], axis=0
    ).astype(x.dtype)                            # (2, Dp)

    tb = _choose_tb(Bp, Dp)
    grid = (Bp // tb,)

    out_shapes = (
        jax.ShapeDtypeStruct((Bp, Dp), x.dtype),  # masked_mu
        jax.ShapeDtypeStruct((Bp, Dp), x.dtype),  # t
    )

    mu, t = pl.pallas_call(
        ib_kernel,
        out_shape=out_shapes,
        grid=grid,
        in_specs=[
            pl.BlockSpec((tb, Dp), lambda i: (i, 0)),   # x tile
            pl.BlockSpec((tb, Dp), lambda i: (i, 0)),   # eps tile
            pl.BlockSpec((2, Dp), lambda i: (0, 0)),    # packed param rows
        ],
        out_specs=[
            pl.BlockSpec((tb, Dp), lambda i: (i, 0)),
            pl.BlockSpec((tb, Dp), lambda i: (i, 0)),
        ],
        compiler_params=pltpu.CompilerParams(
            dimension_semantics=("parallel",)),
    )(x_p, eps_p, params)

    if pad_b or pad_d:
        mu = mu[:B, :D]
        t = t[:B, :D]
    return mu, logvar, t


if __name__ == "__main__":
    # Small shapes consistent with the module: x is (batch, d_model).
    B, D = 16, 128
    key = jax.random.PRNGKey(0)
    kx, keps = jax.random.split(key)
    x = jax.random.normal(kx, (B, D), dtype=jnp.float32)
    # Deterministic parameter init matching nn.Parameter(torch.full((d_model,), 5.0)).
    alpha = jnp.full((D,), 5.0, dtype=jnp.float32)

    mu, logvar, t = ib_forward(x, alpha, keps)
    jax.block_until_ready((mu, logvar, t))

    # Deterministic parts check against a pure-JAX reference of the torch math.
    lamb = jax.nn.sigmoid(alpha)[None, :]
    mu_ref = x * lamb
    logvar_ref = jnp.broadcast_to(jnp.log((1.0 - lamb) ** 2), x.shape)
    assert mu.shape == (B, D) and logvar.shape == (B, D) and t.shape == (B, D)
    assert jnp.allclose(mu, mu_ref, atol=1e-5, rtol=1e-5)
    assert jnp.allclose(logvar, logvar_ref, atol=1e-4, rtol=1e-4)

    # Stochastic part: t = mu + (1 - lamb) * eps with eps ~ N(0, 1).
    assert bool(jnp.all(jnp.isfinite(t)))
    resid = (t - mu_ref) / (1.0 - lamb)
    m, s = float(jnp.mean(resid)), float(jnp.std(resid))
    assert abs(m) < 0.25 and 0.8 < s < 1.2, (m, s)

    print("KERNEL_OK")
</pallas_src>

<mosaic_0001>
module attributes {stable_mosaic.version = 11 : i64} {
  func.func @ib_kernel(%arg0: i32, %arg1: memref<16x128xf32, #tpu.memory_space<vmem>>, %arg2: memref<16x128xf32, #tpu.memory_space<vmem>>, %arg3: memref<2x128xf32, #tpu.memory_space<vmem>>, %arg4: memref<16x128xf32, #tpu.memory_space<vmem>>, %arg5: memref<16x128xf32, #tpu.memory_space<vmem>>) attributes {dimension_semantics = [#tpu.dimension_semantics<parallel>], iteration_bounds = array<i64: 1>, scalar_prefetch = 0 : i64, scratch_operands = 0 : i64, tpu.core_type = #tpu.core_type<tc>, window_params = [{transform_indices = @transform_0, window_bounds = array<i64: 16, 128>}, {transform_indices = @transform_1, window_bounds = array<i64: 16, 128>}, {pipeline_mode = #tpu.pipeline_mode<synchronous>, transform_indices = @transform_2, window_bounds = array<i64: 2, 128>}, {transform_indices = @transform_3, window_bounds = array<i64: 16, 128>}, {transform_indices = @transform_4, window_bounds = array<i64: 16, 128>}]} {
    %c0 = arith.constant 0 : index
    %c0_0 = arith.constant 0 : index
    %0 = vector.load %arg3[%c0, %c0_0] : memref<2x128xf32, #tpu.memory_space<vmem>>, vector<1x128xf32>
    %c1 = arith.constant 1 : index
    %c0_1 = arith.constant 0 : index
    %1 = vector.load %arg3[%c1, %c0_1] : memref<2x128xf32, #tpu.memory_space<vmem>>, vector<1x128xf32>
    %c0_2 = arith.constant 0 : index
    %c0_3 = arith.constant 0 : index
    %2 = vector.load %arg1[%c0_2, %c0_3] : memref<16x128xf32, #tpu.memory_space<vmem>>, vector<16x128xf32>
    %3 = vector.broadcast %0 : vector<1x128xf32> to vector<16x128xf32>
    %4 = arith.mulf %2, %3 : vector<16x128xf32>
    %c0_4 = arith.constant 0 : index
    %c0_5 = arith.constant 0 : index
    %5 = vector.load %arg4[%c0_4, %c0_5] : memref<16x128xf32, #tpu.memory_space<vmem>>, vector<16x128xf32>
    tpu.vector_store %arg4[%c0_4, %c0_5], %4 {strides = array<i32>} : memref<16x128xf32, #tpu.memory_space<vmem>>, vector<16x128xf32>,
    %c0_6 = arith.constant 0 : index
    %c0_7 = arith.constant 0 : index
    %6 = vector.load %arg2[%c0_6, %c0_7] : memref<16x128xf32, #tpu.memory_space<vmem>>, vector<16x128xf32>
    %7 = vector.broadcast %1 : vector<1x128xf32> to vector<16x128xf32>
    %8 = arith.mulf %7, %6 : vector<16x128xf32>
    %9 = arith.addf %4, %8 : vector<16x128xf32>
    %c0_8 = arith.constant 0 : index
    %c0_9 = arith.constant 0 : index
    %10 = vector.load %arg5[%c0_8, %c0_9] : memref<16x128xf32, #tpu.memory_space<vmem>>, vector<16x128xf32>
    tpu.vector_store %arg5[%c0_8, %c0_9], %9 {strides = array<i32>} : memref<16x128xf32, #tpu.memory_space<vmem>>, vector<16x128xf32>,
    return
  }
  func.func @transform_0(%arg0: i32) -> (i32, i32) {
    %c0_i32 = arith.constant 0 : i32
    %c0_i32_0 = arith.constant 0 : i32
    return %arg0, %c0_i32 : i32, i32
  }
  func.func @transform_1(%arg0: i32) -> (i32, i32) {
    %c0_i32 = arith.constant 0 : i32
    %c0_i32_0 = arith.constant 0 : i32
    return %arg0, %c0_i32 : i32, i32
  }
  func.func @transform_2(%arg0: i32) -> (i32, i32) {
    %c0_i32 = arith.constant 0 : i32
    %c0_i32_0 = arith.constant 0 : i32
    %c0_i32_1 = arith.constant 0 : i32
    return %c0_i32, %c0_i32_0 : i32, i32
  }
  func.func @transform_3(%arg0: i32) -> (i32, i32) {
    %c0_i32 = arith.constant 0 : i32
    %c0_i32_0 = arith.constant 0 : i32
    return %arg0, %c0_i32 : i32, i32
  }
  func.func @transform_4(%arg0: i32) -> (i32, i32) {
    %c0_i32 = arith.constant 0 : i32
    %c0_i32_0 = arith.constant 0 : i32
    return %arg0, %c0_i32 : i32, i32
  }
}

</mosaic_0001>

<bundles_post_ra>
// kernel: tpu_custom_call.1
= control target key start
LH: loop header
LB: loop body
LE: loop exit
PB: predicated region body
PF: predicated region fallthrough
CT: control target
= control target key end

     0   :  { %10 = vsyncpa [#allocation3], 0  ;;  %s312_s0 = inlined_call_operand.hbm [shape: f32[16,128], index: 0, kind: input, shape index: {}]   ;;  %s313_s1 = inlined_call_operand.hbm [shape: f32[16,128], index: 1, kind: input, shape index: {}]   ;;  %s314_s2 = inlined_call_operand.vmem [shape: f32[2,128], index: 2, kind: input, shape index: {}]   ;;  %s315_s3 = inlined_call_operand.hbm [shape: f32[16,128], index: 3, kind: output, shape index: {0}]   ;;  %s316_s4 = inlined_call_operand.hbm [shape: f32[16,128], index: 4, kind: output, shape index: {1}]  }
   0x1   :  { %11 = vsyncpa [#allocation6], 0 }
   0x2   :  { %12 = vsyncpa [#allocation4], 0 }
   0x3   :  { %13 = vsyncpa [#allocation9], 0  ;;  %s208_s15 = smov [#allocation2]   ;;  %s112_s19 = scalar_lea.hbm %s312_s0, 256 }
   0x4   :  { %s19_s16 = sshll.u32 %s208_s15, 4  ;;  %p113_p0 = scmp.ne.s32.totalorder %s312_s0, %s112_s19  ;;  %s20_s16 = int_to_ptr.vmem [resolvable:$true] %s19_s16 }
   0x5   :  { %p116_p1 = scmp.lt.u32.totalorder %s112_s19, %s312_s0 }
   0x7   :  { %p118_p2 = pnand %p116_p1, %p113_p0 }
   0x9   :  { %121 = shalt.err (!%p118_p2)
}
   0xa   :  { %s122_s24 = scalar_lea.vmem %s20_s16, 256  ;;  %p127_p4 = scmp.lt.s32.totalorder %s20_s16, %s20_s16 }
   0xb   :  { %p123_p3 = scmp.ne.s32.totalorder %s20_s16, %s122_s24  ;;  %p128_p5 = scmp.lt.s32.totalorder %s122_s24, %s122_s24 }
   0xd   :  { %p129_p6 = por %p128_p5, %p127_p4 }
   0xf   :  { %p130_p7 = pnand %p129_p6, %p123_p3 }
  0x11   :  { %133 = shalt.err (!%p130_p7)
}
  0x12   :  { %s209_s25 = smov 128   ;;  %s210_s26 = smov 8  }
  0x13   :  { %25 = dma.hbm_to_vmem [thread:$0]  %s312_s0, 256, %s20_s16, [#allocation3], %s209_s25, %s209_s25, %s210_s26  }
  0x14   :  { %s211_s29 = smov [#allocation5]   ;;  %s134_s7 = scalar_lea.hbm %s313_s1, 256 }
  0x15   :  { %s31_s30 = sshll.u32 %s211_s29, 4  ;;  %p135_p8 = scmp.ne.s32.totalorder %s313_s1, %s134_s7  ;;  %s32_s30 = int_to_ptr.vmem [resolvable:$true] %s31_s30 }
  0x16   :  { %p138_p9 = scmp.lt.u32.totalorder %s134_s7, %s313_s1 }
  0x18   :  { %p140_p10 = pnand %p138_p9, %p135_p8 }
  0x1a   :  { %143 = shalt.err (!%p140_p10)
}
  0x1b   :  { %s144_s12 = scalar_lea.vmem %s32_s30, 256  ;;  %p149_p12 = scmp.lt.s32.totalorder %s32_s30, %s32_s30 }
  0x1c   :  { %p145_p11 = scmp.ne.s32.totalorder %s32_s30, %s144_s12  ;;  %p150_p13 = scmp.lt.s32.totalorder %s144_s12, %s144_s12 }
  0x1e   :  { %p151_p0 = por %p150_p13, %p149_p12 }
  0x20   :  { %p152_p1 = pnand %p151_p0, %p145_p11 }
  0x22   :  { %155 = shalt.err (!%p152_p1)
}
  0x23   :  { %37 = dma.hbm_to_vmem [thread:$0]  %s313_s1, 256, %s32_s30, [#allocation6], %s209_s25, %s209_s25, %s210_s26  }
  0x24   :  { %200 = dma.done.wait [#allocation3], 256  }
  0x25   :  { %201 = vsyncadd [#allocation3], 4294967040 }
  0x26   :  { %202 = dma.done.wait [#allocation6], 256  }
  0x27   :  { %203 = vsyncadd [#allocation6], 4294967040  ;;  %s212_s14 = smov [#allocation7]   ;;  %v104_v0 = vld [vmem:[%s314_s2] ss:$0 sm:$0xff]  ;;  %v49_v2 = vld [vmem:[#allocation2 + $0x8] sm:$0xff] }
  0x28   :  { %s75_s15 = sshll.u32 %s212_s14, 4  ;;  %v48_v1 = vld [vmem:[#allocation2] sm:$0xff]  ;;  %s213_s18 = smov [#allocation8]   ;;  %v55_v4 = vmul.f32 %v104_v0, %v49_v2  ;;  %v58_v6 = vld [vmem:[#allocation5] sm:$0xff]  ;;  %v59_v7 = vld [vmem:[#allocation5 + $0x8] sm:$0xff]  ;;  %s76_s15 = int_to_ptr.vmem [resolvable:$true] %s75_s15 }
  0x29   :  { %s87_s19 = sshll.u32 %s213_s18, 4  ;;  %v54_v3 = vmul.f32 %v104_v0, %v48_v1  ;;  %v105_v5 = vld [vmem:[%s314_s2 + $0x1] ss:$0 sm:$0xff]  ;;  %s156_s1 = scalar_lea.vmem %s76_s15, 256  ;;  %s275_s19 = int_to_ptr.vmem [resolvable:$true] %s87_s19 }
  0x2a   :  { %v64_v8 = vmul.f32 %v105_v5, %v58_v6  ;;  %v65_v9 = vmul.f32 %v105_v5, %v59_v7  ;;  %57 = vst [vmem:[#allocation7 + $0x8] sm:$0xff] %v55_v4  ;;  %p157_p2 = scmp.ne.s32.totalorder %s76_s15, %s156_s1  ;;  %p161_p3 = scmp.lt.s32.totalorder %s76_s15, %s76_s15 }
  0x2b   :  { %56 = vst [vmem:[#allocation7] sm:$0xff] %v54_v3  ;;  %p162_p4 = scmp.lt.s32.totalorder %s156_s1, %s156_s1 }
  0x2c   :  { %v66_v10 = vadd.f32 %v64_v8, %v54_v3  ;;  %v67_v11 = vadd.f32 %v65_v9, %v55_v4 }
  0x2d   :  { %p163_p5 = por %p162_p4, %p161_p3 }
  0x2f   :  { %p164_p6 = pnand %p163_p5, %p157_p2 }
  0x31   :  { %167 = shalt.err (!%p164_p6)
}
  0x32   :  { %s168_s23 = scalar_lea.hbm %s315_s3, 256 }
  0x33   :  { %p169_p7 = scmp.ne.s32.totalorder %s315_s3, %s168_s23  ;;  %p172_p8 = scmp.lt.u32.totalorder %s168_s23, %s315_s3 }
  0x35   :  { %p174_p9 = pnand %p172_p8, %p169_p7 }
  0x37   :  { %177 = shalt.err (!%p174_p9)
}
  0x38   :  { %81 = dma.vmem_to_hbm [thread:$0]  %s76_s15, 256, %s315_s3, [#allocation4], %s209_s25, %s209_s25, %s210_s26   ;;  %68 = vst [vmem:[#allocation8] sm:$0xff] %v66_v10  ;;  %69 = vst [vmem:[#allocation8 + $0x8] sm:$0xff] %v67_v11 }
  0x39   :  { %s178_s6 = scalar_lea.vmem %s275_s19, 256  ;;  %p183_p11 = scmp.lt.s32.totalorder %s275_s19, %s275_s19 }
  0x3a   :  { %p179_p10 = scmp.ne.s32.totalorder %s275_s19, %s178_s6  ;;  %p184_p12 = scmp.lt.s32.totalorder %s178_s6, %s178_s6 }
  0x3c   :  { %p185_p13 = por %p184_p12, %p183_p11 }
  0x3e   :  { %p186_p0 = pnand %p185_p13, %p179_p10 }
  0x40   :  { %189 = shalt.err (!%p186_p0)
}
  0x41   :  { %s190_s9 = scalar_lea.hbm %s316_s4, 256 }
  0x42   :  { %p191_p1 = scmp.ne.s32.totalorder %s316_s4, %s190_s9  ;;  %p194_p2 = scmp.lt.u32.totalorder %s190_s9, %s316_s4 }
  0x44   :  { %p196_p3 = pnand %p194_p2, %p191_p1 }
  0x46   :  { %199 = shalt.err (!%p196_p3)
}
  0x47   :  { %93 = dma.vmem_to_hbm [thread:$0]  %s275_s19, 256, %s316_s4, [#allocation9], %s209_s25, %s209_s25, %s210_s26  }
  0x48   :  { %204 = dma.done.wait [#allocation4], 256  }
  0x49   :  { %205 = vsyncadd [#allocation4], 4294967040 }
  0x4a   :  { %206 = dma.done.wait [#allocation9], 256  }
  0x4b   :  { %207 = vsyncadd [#allocation9], 4294967040 }
  0x4c   :  { %100 = vsyncpa [#allocation3], 1 }
  0x4d   :  { %101 = vsyncpa [#allocation6], 1 }
  0x4e   :  { %102 = vsyncpa [#allocation4], 1 }
  0x4f   :  { %103 = vsyncpa [#allocation9], 1 }

</bundles_post_ra>
